<compile_context>
chip_gen: v5e
topology: v5e:2x2
jax: 0.10.0
libtpu: 0.0.40
codegen_flags: <defaults>
</compile_context>

<pallas_src>
import math

import jax
import jax.numpy as jnp
from jax.experimental import pallas as pl
from jax.experimental.pallas import tpu as pltpu


def _pe_add_kernel(x_ref, pe_ref, o_ref):
    # x_ref / pe_ref / o_ref are all (tS, W) VMEM tiles with identical shapes:
    # a pure lane-dense VPU add; DMA in/out is pipelined by BlockSpec.
    o_ref[...] = x_ref[...] + pe_ref[...]


def make_positional_encoding_table(d_model: int, max_len: int = 5000) -> jnp.ndarray:
    """Builds the (max_len, d_model) sinusoidal table (deterministic, no params)."""
    position = jnp.arange(max_len, dtype=jnp.float32)[:, None]            # (L, 1)
    div_term = jnp.exp(
        jnp.arange(0, d_model, 2, dtype=jnp.float32) * (-math.log(10000.0) / d_model)
    )                                                                     # (D/2,)
    ang = position * div_term                                             # (L, D/2)
    pe = jnp.zeros((max_len, d_model), dtype=jnp.float32)
    pe = pe.at[:, 0::2].set(jnp.sin(ang))
    pe = pe.at[:, 1::2].set(jnp.cos(ang))
    return pe


def positional_encoding_forward(
    x: jnp.ndarray, pe: jnp.ndarray, *, target_block_bytes: int = 2 << 20
) -> jnp.ndarray:
    """x: (S, B, D); pe: (max_len, D). Returns x + pe[:S] broadcast over B."""
    S, B, D = x.shape
    F = B * D
    itemsize = jnp.dtype(x.dtype).itemsize

    pe_s = pe[:S].astype(x.dtype)   # slice + one-time cast (bf16 models supported)
    x2 = x.reshape(S, F)            # free reshape -> lane-dense flattened layout

    if D % 128 == 0:
        # Common case: one batch element per feature block; pe stays (S, D) and
        # is DMA'd once per seq tile (its index_map ignores the batch axis).
        tF, n_bt = D, B
        pe_arg = pe_s                       # (S, D)
    else:
        # Small / non-128-aligned d_model: keep the full flattened feature axis
        # (block last dim == full array dim, so the (8,128) rule is satisfied)
        # and pre-tile pe once so the kernel remains a plain add.
        tF, n_bt = F, 1
        pe_arg = jnp.tile(pe_s, (1, B))     # (S, F); pe_tiled[s, b*D+d] = pe[s, d]
    pe_w = pe_arg.shape[1]

    # Seq tile: multiple of 8 (or == S), sized so one x block ~= target bytes.
    row_bytes = tF * itemsize
    tS = max(1, target_block_bytes // max(row_bytes, 1))
    if tS >= S:
        tS = S
    else:
        tS = max(8, (tS // 8) * 8)
    n_st = pl.cdiv(S, tS)

    # Scoped-VMEM budget: double-buffered x + out + pe blocks (+ slack).
    x_block_bytes = tS * tF * itemsize
    pe_block_bytes = tS * pe_w * itemsize
    vmem_need = 2 * (2 * x_block_bytes + pe_block_bytes) + (2 << 20)
    vmem_limit = min(max(vmem_need, 32 << 20), 64 << 20)

    out2 = pl.pallas_call(
        _pe_add_kernel,
        out_shape=jax.ShapeDtypeStruct((S, F), x.dtype),
        grid_spec=pltpu.PrefetchScalarGridSpec(
            num_scalar_prefetch=0,
            grid=(n_st, n_bt),              # seq tiles outer, batch elements inner
            in_specs=[
                pl.BlockSpec((tS, tF), lambda s, b: (s, b)),
                pl.BlockSpec((tS, pe_w), lambda s, b: (s, 0)),  # ignores b
            ],
            out_specs=pl.BlockSpec((tS, tF), lambda s, b: (s, b)),
        ),
        compiler_params=pltpu.CompilerParams(
            dimension_semantics=("parallel", "parallel"),
            vmem_limit_bytes=vmem_limit,
        ),
    )(x2, pe_arg)

    return out2.reshape(S, B, D)


if __name__ == "__main__":
    key = jax.random.PRNGKey(0)

    # Small shapes consistent with the module: seq=8, batch=2, d_model=32.
    S, B, D = 8, 2, 32
    pe = make_positional_encoding_table(D, max_len=64)
    x = jax.random.normal(key, (S, B, D), dtype=jnp.float32)

    out = jax.block_until_ready(positional_encoding_forward(x, pe))
    ref = x + pe[:S][:, None, :]
    assert out.shape == (S, B, D)
    assert jnp.allclose(out, ref, atol=1e-6), "mismatch vs reference (small case)"

    # Second check: exercises the tiled multi-block path (D % 128 == 0 case),
    # with a tiny block budget to force a (seq-tiles x batch) grid.
    S2, B2, D2 = 64, 4, 128
    pe2 = make_positional_encoding_table(D2, max_len=128)
    x2 = jax.random.normal(jax.random.PRNGKey(0), (S2, B2, D2), dtype=jnp.float32)
    out2 = jax.block_until_ready(
        positional_encoding_forward(x2, pe2, target_block_bytes=4096)
    )
    ref2 = x2 + pe2[:S2][:, None, :]
    assert jnp.allclose(out2, ref2, atol=1e-6), "mismatch vs reference (tiled case)"

    print("KERNEL_OK")
</pallas_src>

<mosaic_0001>
module attributes {stable_mosaic.version = 11 : i64} {
  func.func @_pe_add_kernel(%arg0: i32, %arg1: i32, %arg2: memref<8x64xf32, #tpu.memory_space<vmem>>, %arg3: memref<8x64xf32, #tpu.memory_space<vmem>>, %arg4: memref<8x64xf32, #tpu.memory_space<vmem>>) attributes {dimension_semantics = [#tpu.dimension_semantics<parallel>, #tpu.dimension_semantics<parallel>], iteration_bounds = array<i64: 1, 1>, scalar_prefetch = 0 : i64, scratch_operands = 0 : i64, tpu.core_type = #tpu.core_type<tc>, window_params = [{transform_indices = @transform_0, window_bounds = array<i64: 8, 64>}, {transform_indices = @transform_1, window_bounds = array<i64: 8, 64>}, {transform_indices = @transform_2, window_bounds = array<i64: 8, 64>}]} {
    %c0 = arith.constant 0 : index
    %c0_0 = arith.constant 0 : index
    %0 = vector.load %arg2[%c0, %c0_0] : memref<8x64xf32, #tpu.memory_space<vmem>>, vector<8x64xf32>
    %c0_1 = arith.constant 0 : index
    %c0_2 = arith.constant 0 : index
    %1 = vector.load %arg3[%c0_1, %c0_2] : memref<8x64xf32, #tpu.memory_space<vmem>>, vector<8x64xf32>
    %2 = arith.addf %0, %1 : vector<8x64xf32>
    %c0_3 = arith.constant 0 : index
    %c0_4 = arith.constant 0 : index
    %3 = vector.load %arg4[%c0_3, %c0_4] : memref<8x64xf32, #tpu.memory_space<vmem>>, vector<8x64xf32>
    tpu.vector_store %arg4[%c0_3, %c0_4], %2 {strides = array<i32>} : memref<8x64xf32, #tpu.memory_space<vmem>>, vector<8x64xf32>,
    return
  }
  func.func @transform_0(%arg0: i32, %arg1: i32) -> (i32, i32) {
    %c0_i32 = arith.constant 0 : i32
    return %arg0, %arg1 : i32, i32
  }
  func.func @transform_1(%arg0: i32, %arg1: i32) -> (i32, i32) {
    %c0_i32 = arith.constant 0 : i32
    %c0_i32_0 = arith.constant 0 : i32
    return %arg0, %c0_i32 : i32, i32
  }
  func.func @transform_2(%arg0: i32, %arg1: i32) -> (i32, i32) {
    %c0_i32 = arith.constant 0 : i32
    return %arg0, %arg1 : i32, i32
  }
}

</mosaic_0001>

<bundles_post_ra>
// kernel: tpu_custom_call.1
= control target key start
LH: loop header
LB: loop body
LE: loop exit
PB: predicated region body
PF: predicated region fallthrough
CT: control target
= control target key end

     0   :  { %7 = vsyncpa [#allocation3], 0  ;;  %s171_s0 = inlined_call_operand.hbm [shape: f32[8,64], index: 0, kind: input, shape index: {}]   ;;  %s172_s1 = inlined_call_operand.hbm [shape: f32[8,64], index: 1, kind: input, shape index: {}]   ;;  %s173_s2 = inlined_call_operand.hbm [shape: f32[8,64], index: 2, kind: output, shape index: {}]  }
   0x1   :  { %8 = vsyncpa [#allocation6], 0 }
   0x2   :  { %9 = vsyncpa [#allocation4], 0  ;;  %s15_s11 = sshll.u32 %s171_s0, 4  ;;  %s144_s12 = smov [#allocation2]   ;;  %s16_s11 = int_to_ptr.hbm [resolvable:$true] %s15_s11 }
   0x3   :  { %s17_s13 = sshll.u32 %s144_s12, 4  ;;  %s26_s16 = sshll.u32 %s172_s1, 4  ;;  %s18_s13 = int_to_ptr.vmem [resolvable:$true] %s17_s13  ;;  %s27_s16 = int_to_ptr.hbm [resolvable:$true] %s26_s16 }
   0x4   :  { %20 = dma.hbm_to_vmem [thread:$0]  %s16_s11, 128, %s18_s13, [#allocation3]  }
   0x5   :  { %s145_s17 = smov [#allocation5]  }
   0x6   :  { %s28_s18 = sshll.u32 %s145_s17, 4  ;;  %s29_s18 = int_to_ptr.vmem [resolvable:$true] %s28_s18 }
   0x7   :  { %31 = dma.hbm_to_vmem [thread:$0]  %s27_s16, 128, %s29_s18, [#allocation6]  }
   0x8   :  { %138 = dma.done.wait [#allocation3], 128  }
   0x9   :  { %139 = vsyncadd [#allocation3], 4294967168 }
   0xa   :  { %140 = dma.done.wait [#allocation6], 128  }
   0xb   :  { %141 = vsyncadd [#allocation6], 4294967168  ;;  %s146_s19 = smov [#allocation7]   ;;  %s52_s22 = sshll.u32 %s173_s2, 4  ;;  %v40_v0 = vld [vmem:[#allocation2] sm:$0xff]  ;;  %v41_v1 = vld [vmem:[#allocation5] sm:$0xff]  ;;  %s53_s22 = int_to_ptr.hbm [resolvable:$true] %s52_s22 }
   0xc   :  { %s50_s0 = sshll.u32 %s146_s19, 4  ;;  %vm43_vm0 = vcmask 523264   ;;  %v42_v2 = vadd.f32 %v41_v1, %v40_v0  ;;  %s51_s0 = int_to_ptr.vmem [resolvable:$true] %s50_s0 }
   0xe   :  { %44 = vst.msk [vmem:[#allocation7] sm:$0xff] %vm43_vm0, %v42_v2 }
   0xf   :  { %55 = dma.vmem_to_hbm [thread:$0]  %s51_s0, 128, %s53_s22, [#allocation4]  }
  0x10   :  { %142 = dma.done.wait [#allocation4], 128  }
  0x11   :  { %143 = vsyncadd [#allocation4], 4294967168 }
  0x12   :  { %60 = vsyncpa [#allocation3], 1 }
  0x13   :  { %61 = vsyncpa [#allocation6], 1 }
  0x14   :  { %62 = vsyncpa [#allocation4], 1 }

</bundles_post_ra>
